<compile_context>
chip_gen: v6e
topology: v6e:2x2x1
jax: 0.10.0
libtpu: 0.0.40
codegen_flags: <defaults>
</compile_context>

<pallas_src>
import functools
import math

import jax
import jax.numpy as jnp
import numpy as np
from jax.experimental import pallas as pl
from jax.experimental.pallas import tpu as pltpu


def mha_kernel(x_ref, wqkv_ref, bqkv_ref, wo_ref, bo_ref, out_ref, attn_ref,
               *, num_heads, d_k, mxu_dtype):
    d_model = num_heads * d_k

    x = x_ref[0]                                                   # (S, D), mxu_dtype

    # Single fused, lane-dense QKV projection: (S, D) @ (D, 3D), f32 accumulate.
    # The 1/sqrt(d_k) score scale is already folded into the Q columns.
    qkv = jnp.dot(x, wqkv_ref[...],
                  preferred_element_type=jnp.float32) + bqkv_ref[...]     # (S, 3D) f32

    # Head-major relayout -> (H, S, d_k) so attention runs as two head-batched
    # einsums instead of H separate matmul/softmax chains.
    def split_heads(t2d):                                          # (S, D) -> (H, S, d_k)
        return jnp.stack(
            [t2d[:, h * d_k:(h + 1) * d_k] for h in range(num_heads)], axis=0)

    q = split_heads(qkv[:, :d_model]).astype(mxu_dtype)
    k = split_heads(qkv[:, d_model:2 * d_model]).astype(mxu_dtype)
    v = split_heads(qkv[:, 2 * d_model:]).astype(mxu_dtype)

    scores = jnp.einsum("hqd,hkd->hqk", q, k,
                        preferred_element_type=jnp.float32)        # (H, S, S) f32

    # Softmax statistics in f32 (accuracy; v5e VPU/EUP have no bf16 path).
    m = jnp.max(scores, axis=-1, keepdims=True)
    e = jnp.exp(scores - m)
    denom = jnp.sum(e, axis=-1, keepdims=True)
    r = pl.reciprocal(denom, approx=True)                          # EUP slot (free)
    r = r * (2.0 - denom * r)                                      # Newton step 1
    r = r * (2.0 - denom * r)                                      # Newton step 2 -> f32 acc.
    attn = e * r                                                   # (H, S, S) f32

    attn_ref[0] = attn.astype(attn_ref.dtype)                      # one bulk store

    ctx = jnp.einsum("hqk,hkd->hqd", attn.astype(mxu_dtype), v,
                     preferred_element_type=jnp.float32)           # (H, S, d_k)

    # Merge heads back to a lane-dense (S, D) block -> single K=D output proj.
    ctx2d = jnp.concatenate([ctx[h] for h in range(num_heads)], axis=-1)
    out = jnp.dot(ctx2d.astype(mxu_dtype), wo_ref[...],
                  preferred_element_type=jnp.float32) + bo_ref[...]      # (S, D)
    out_ref[0] = out.astype(out_ref.dtype)


def multi_head_attention(x, params, num_heads, *, mxu_dtype=jnp.float32):
    """x: (B, S, D) f32. params: torch-layout Linear weights (out,in) and biases.

    Eval-mode forward of the PyTorch MultiHeadAttention (mask=None, dropout
    inactive). Returns (output (B,S,D) f32, attention_weights (B,H,S,S) f32).
    """
    B, S, D = x.shape
    H = num_heads
    d_k = D // H
    scale = 1.0 / math.sqrt(d_k)

    # torch Linear: y = x @ W.T + b.  Fold the 1/sqrt(d_k) scale into the Q
    # projection (free at trace time) and fuse Q|K|V into one (D, 3D) weight so
    # the kernel runs a single lane-dense projection matmul per batch block.
    wqkv = jnp.concatenate(
        [params["wq"].T * scale, params["wk"].T, params["wv"].T], axis=1)   # (D, 3D)
    bqkv = jnp.concatenate(
        [params["bq"] * scale, params["bk"], params["bv"]]).reshape(1, 3 * D)
    wo = params["wo"].T                                                     # (D, D)
    bo = params["bo"].reshape(1, D)

    # bf16 MXU operands (f32 accumulation) halve weight/activation DMA bytes and
    # run the MXU at native rate; biases stay f32 (added post-accumulation).
    x_in = x.astype(mxu_dtype)
    wqkv = wqkv.astype(mxu_dtype)
    wo = wo.astype(mxu_dtype)

    kernel = functools.partial(mha_kernel, num_heads=H, d_k=d_k,
                               mxu_dtype=mxu_dtype)

    # Weights/biases have a constant block index -> single-buffer them so the
    # pipeline does not allocate useless VMEM double buffers for them.
    def const_spec(shape):
        return pl.BlockSpec(shape, lambda b: (0,) * len(shape),
                            pipeline_mode=pl.Buffered(1))

    out, attn = pl.pallas_call(
        kernel,
        out_shape=(
            jax.ShapeDtypeStruct((B, S, D), jnp.float32),
            jax.ShapeDtypeStruct((B, H, S, S), jnp.float32),
        ),
        grid_spec=pltpu.PrefetchScalarGridSpec(
            num_scalar_prefetch=0,
            grid=(B,),
            in_specs=[
                pl.BlockSpec((1, S, D), lambda b: (b, 0, 0)),      # x (per-batch tile)
                const_spec((D, 3 * D)),                            # Wqkv (fetched once)
                const_spec((1, 3 * D)),                            # bqkv
                const_spec((D, D)),                                # Wo
                const_spec((1, D)),                                # bo
            ],
            out_specs=[
                pl.BlockSpec((1, S, D), lambda b: (b, 0, 0)),          # output
                pl.BlockSpec((1, H, S, S), lambda b: (b, 0, 0, 0)),    # attn probs
            ],
        ),
        compiler_params=pltpu.CompilerParams(
            dimension_semantics=("parallel",)),
    )(x_in, wqkv, bqkv, wo, bo)
    return out, attn


def reference_mha(x, params, num_heads):
    B, S, D = x.shape
    H = num_heads
    d_k = D // H

    def lin(xx, w, b):
        return xx @ w.T + b

    q = lin(x, params["wq"], params["bq"]).reshape(B, S, H, d_k).transpose(0, 2, 1, 3)
    k = lin(x, params["wk"], params["bk"]).reshape(B, S, H, d_k).transpose(0, 2, 1, 3)
    v = lin(x, params["wv"], params["bv"]).reshape(B, S, H, d_k).transpose(0, 2, 1, 3)
    scores = jnp.einsum("bhqd,bhkd->bhqk", q, k) / math.sqrt(d_k)
    attn = jax.nn.softmax(scores, axis=-1)
    ctx = jnp.einsum("bhqk,bhkd->bhqd", attn, v)
    ctx = ctx.transpose(0, 2, 1, 3).reshape(B, S, D)
    out = lin(ctx, params["wo"], params["bo"])
    return out, attn


if __name__ == "__main__":
    B, S, D, H = 2, 8, 32, 4

    key = jax.random.PRNGKey(0)
    keys = jax.random.split(key, 9)
    bound = 1.0 / math.sqrt(D)  # nn.Linear default init range

    params = {
        "wq": jax.random.uniform(keys[0], (D, D), jnp.float32, -bound, bound),
        "bq": jax.random.uniform(keys[1], (D,), jnp.float32, -bound, bound),
        "wk": jax.random.uniform(keys[2], (D, D), jnp.float32, -bound, bound),
        "bk": jax.random.uniform(keys[3], (D,), jnp.float32, -bound, bound),
        "wv": jax.random.uniform(keys[4], (D, D), jnp.float32, -bound, bound),
        "bv": jax.random.uniform(keys[5], (D,), jnp.float32, -bound, bound),
        "wo": jax.random.uniform(keys[6], (D, D), jnp.float32, -bound, bound),
        "bo": jax.random.uniform(keys[7], (D,), jnp.float32, -bound, bound),
    }
    x = jax.random.normal(keys[8], (B, S, D), jnp.float32)

    ref_out, ref_attn = reference_mha(x, params, H)

    # Exact-precision path (f32 MXU operands): must match the reference tightly.
    out, attn = multi_head_attention(x, params, H, mxu_dtype=jnp.float32)
    out, attn = jax.block_until_ready((out, attn))
    np.testing.assert_allclose(np.asarray(out), np.asarray(ref_out), rtol=1e-5, atol=1e-5)
    np.testing.assert_allclose(np.asarray(attn), np.asarray(ref_attn), rtol=1e-5, atol=1e-5)

    # Production path (bf16 MXU operands, f32 accumulation / softmax stats).
    out_bf, attn_bf = multi_head_attention(x, params, H, mxu_dtype=jnp.bfloat16)
    out_bf, attn_bf = jax.block_until_ready((out_bf, attn_bf))
    np.testing.assert_allclose(np.asarray(out_bf), np.asarray(ref_out), rtol=5e-2, atol=5e-2)
    np.testing.assert_allclose(np.asarray(attn_bf), np.asarray(ref_attn), rtol=5e-2, atol=5e-2)

    print("KERNEL_OK")
</pallas_src>

<mosaic_0001>
module attributes {stable_mosaic.version = 11 : i64} {
  func.func @mha_kernel(%arg0: i32, %arg1: memref<1x8x32xf32, #tpu.memory_space<vmem>>, %arg2: memref<32x96xf32, #tpu.memory_space<vmem>>, %arg3: memref<1x96xf32, #tpu.memory_space<vmem>>, %arg4: memref<32x32xf32, #tpu.memory_space<vmem>>, %arg5: memref<1x32xf32, #tpu.memory_space<vmem>>, %arg6: memref<1x8x32xf32, #tpu.memory_space<vmem>>, %arg7: memref<1x4x8x8xf32, #tpu.memory_space<vmem>>) attributes {dimension_semantics = [#tpu.dimension_semantics<parallel>], iteration_bounds = array<i64: 2>, scalar_prefetch = 0 : i64, scratch_operands = 0 : i64, tpu.core_type = #tpu.core_type<tc>, window_params = [{transform_indices = @transform_0, window_bounds = array<i64: 1, 8, 32>}, {pipeline_mode = #tpu.pipeline_mode<synchronous>, transform_indices = @transform_1, window_bounds = array<i64: 32, 96>}, {pipeline_mode = #tpu.pipeline_mode<synchronous>, transform_indices = @transform_2, window_bounds = array<i64: 1, 96>}, {pipeline_mode = #tpu.pipeline_mode<synchronous>, transform_indices = @transform_3, window_bounds = array<i64: 32, 32>}, {pipeline_mode = #tpu.pipeline_mode<synchronous>, transform_indices = @transform_4, window_bounds = array<i64: 1, 32>}, {transform_indices = @transform_5, window_bounds = array<i64: 1, 8, 32>}, {transform_indices = @transform_6, window_bounds = array<i64: 1, 4, 8, 8>}]} {
    %c0 = arith.constant 0 : index
    %c0_0 = arith.constant 0 : index
    %c0_1 = arith.constant 0 : index
    %0 = vector.load %arg1[%c0, %c0_0, %c0_1] : memref<1x8x32xf32, #tpu.memory_space<vmem>>, vector<1x8x32xf32>
    %1 = vector.shape_cast %0 : vector<1x8x32xf32> to vector<8x32xf32>
    %c0_2 = arith.constant 0 : index
    %c0_3 = arith.constant 0 : index
    %2 = vector.load %arg2[%c0_2, %c0_3] : memref<32x96xf32, #tpu.memory_space<vmem>>, vector<32x96xf32>
    %cst = arith.constant dense<0.000000e+00> : vector<8x96xf32>
    %3 = tpu.matmul %1, %2, %cst {dimension_numbers = #tpu.dot_dimension_numbers<[1], [0], [0], [1], [0, 0, 1, 1], [], []>} : vector<8x32xf32>, vector<32x96xf32>, vector<8x96xf32> -> vector<8x96xf32>
    %c0_4 = arith.constant 0 : index
    %c0_5 = arith.constant 0 : index
    %4 = vector.load %arg3[%c0_4, %c0_5] : memref<1x96xf32, #tpu.memory_space<vmem>>, vector<1x96xf32>
    %5 = vector.broadcast %4 : vector<1x96xf32> to vector<8x96xf32>
    %6 = arith.addf %3, %5 : vector<8x96xf32>
    %7 = vector.extract_strided_slice %6 {offsets = [0, 0], sizes = [8, 32], strides = [1, 1]} : vector<8x96xf32> to vector<8x32xf32>
    %8 = vector.extract_strided_slice %7 {offsets = [0, 0], sizes = [8, 8], strides = [1, 1]} : vector<8x32xf32> to vector<8x8xf32>
    %9 = vector.extract_strided_slice %7 {offsets = [0, 8], sizes = [8, 8], strides = [1, 1]} : vector<8x32xf32> to vector<8x8xf32>
    %10 = vector.extract_strided_slice %7 {offsets = [0, 16], sizes = [8, 8], strides = [1, 1]} : vector<8x32xf32> to vector<8x8xf32>
    %11 = vector.extract_strided_slice %7 {offsets = [0, 24], sizes = [8, 8], strides = [1, 1]} : vector<8x32xf32> to vector<8x8xf32>
    %12 = vector.shape_cast %8 : vector<8x8xf32> to vector<1x8x8xf32>
    %13 = vector.shape_cast %9 : vector<8x8xf32> to vector<1x8x8xf32>
    %14 = vector.shape_cast %10 : vector<8x8xf32> to vector<1x8x8xf32>
    %15 = vector.shape_cast %11 : vector<8x8xf32> to vector<1x8x8xf32>
    %16 = tpu.concatenate %12, %13, %14, %15 in 0 : vector<1x8x8xf32>, vector<1x8x8xf32>, vector<1x8x8xf32>, vector<1x8x8xf32> -> vector<4x8x8xf32>
    %17 = vector.extract_strided_slice %6 {offsets = [0, 32], sizes = [8, 32], strides = [1, 1]} : vector<8x96xf32> to vector<8x32xf32>
    %18 = vector.extract_strided_slice %17 {offsets = [0, 0], sizes = [8, 8], strides = [1, 1]} : vector<8x32xf32> to vector<8x8xf32>
    %19 = vector.extract_strided_slice %17 {offsets = [0, 8], sizes = [8, 8], strides = [1, 1]} : vector<8x32xf32> to vector<8x8xf32>
    %20 = vector.extract_strided_slice %17 {offsets = [0, 16], sizes = [8, 8], strides = [1, 1]} : vector<8x32xf32> to vector<8x8xf32>
    %21 = vector.extract_strided_slice %17 {offsets = [0, 24], sizes = [8, 8], strides = [1, 1]} : vector<8x32xf32> to vector<8x8xf32>
    %22 = vector.shape_cast %18 : vector<8x8xf32> to vector<1x8x8xf32>
    %23 = vector.shape_cast %19 : vector<8x8xf32> to vector<1x8x8xf32>
    %24 = vector.shape_cast %20 : vector<8x8xf32> to vector<1x8x8xf32>
    %25 = vector.shape_cast %21 : vector<8x8xf32> to vector<1x8x8xf32>
    %26 = tpu.concatenate %22, %23, %24, %25 in 0 : vector<1x8x8xf32>, vector<1x8x8xf32>, vector<1x8x8xf32>, vector<1x8x8xf32> -> vector<4x8x8xf32>
    %27 = vector.extract_strided_slice %6 {offsets = [0, 64], sizes = [8, 32], strides = [1, 1]} : vector<8x96xf32> to vector<8x32xf32>
    %28 = vector.extract_strided_slice %27 {offsets = [0, 0], sizes = [8, 8], strides = [1, 1]} : vector<8x32xf32> to vector<8x8xf32>
    %29 = vector.extract_strided_slice %27 {offsets = [0, 8], sizes = [8, 8], strides = [1, 1]} : vector<8x32xf32> to vector<8x8xf32>
    %30 = vector.extract_strided_slice %27 {offsets = [0, 16], sizes = [8, 8], strides = [1, 1]} : vector<8x32xf32> to vector<8x8xf32>
    %31 = vector.extract_strided_slice %27 {offsets = [0, 24], sizes = [8, 8], strides = [1, 1]} : vector<8x32xf32> to vector<8x8xf32>
    %32 = vector.shape_cast %28 : vector<8x8xf32> to vector<1x8x8xf32>
    %33 = vector.shape_cast %29 : vector<8x8xf32> to vector<1x8x8xf32>
    %34 = vector.shape_cast %30 : vector<8x8xf32> to vector<1x8x8xf32>
    %35 = vector.shape_cast %31 : vector<8x8xf32> to vector<1x8x8xf32>
    %36 = tpu.concatenate %32, %33, %34, %35 in 0 : vector<1x8x8xf32>, vector<1x8x8xf32>, vector<1x8x8xf32>, vector<1x8x8xf32> -> vector<4x8x8xf32>
    "tpu.trace_start"() <{level = 10 : i32, message = "hqd,hkd->hqk"}> : () -> ()
    %cst_6 = arith.constant dense<0.000000e+00> : vector<4x8x8xf32>
    %37 = tpu.matmul %16, %26, %cst_6 {dimension_numbers = #tpu.dot_dimension_numbers<[2], [2], [1], [1], [0, 0, 0, 1, 1, 1], [0], [0]>} : vector<4x8x8xf32>, vector<4x8x8xf32>, vector<4x8x8xf32> -> vector<4x8x8xf32>
    "tpu.trace_stop"() : () -> ()
    %cst_7 = arith.constant dense<0xFF800000> : vector<4x8xf32>
    %38 = vector.multi_reduction <maximumf>, %37, %cst_7 [2] : vector<4x8x8xf32> to vector<4x8xf32>
    %39 = vector.shape_cast %38 : vector<4x8xf32> to vector<4x8x1xf32>
    %40 = vector.broadcast %39 : vector<4x8x1xf32> to vector<4x8x8xf32>
    %41 = arith.subf %37, %40 : vector<4x8x8xf32>
    %42 = math.exp %41 : vector<4x8x8xf32>
    %cst_8 = arith.constant dense<0.000000e+00> : vector<4x8xf32>
    %43 = vector.multi_reduction <add>, %42, %cst_8 [2] : vector<4x8x8xf32> to vector<4x8xf32>
    %44 = vector.shape_cast %43 : vector<4x8xf32> to vector<4x8x1xf32>
    %45 = tpu.reciprocal %44 {approx = true} : vector<4x8x1xf32> -> vector<4x8x1xf32>
    %46 = arith.mulf %44, %45 : vector<4x8x1xf32>
    %cst_9 = arith.constant 2.000000e+00 : f32
    %47 = vector.broadcast %cst_9 : f32 to vector<4x8x1xf32>
    %48 = arith.subf %47, %46 : vector<4x8x1xf32>
    %49 = arith.mulf %45, %48 : vector<4x8x1xf32>
    %50 = arith.mulf %44, %49 : vector<4x8x1xf32>
    %cst_10 = arith.constant 2.000000e+00 : f32
    %51 = vector.broadcast %cst_10 : f32 to vector<4x8x1xf32>
    %52 = arith.subf %51, %50 : vector<4x8x1xf32>
    %53 = arith.mulf %49, %52 : vector<4x8x1xf32>
    %54 = vector.broadcast %53 : vector<4x8x1xf32> to vector<4x8x8xf32>
    %55 = arith.mulf %42, %54 : vector<4x8x8xf32>
    %c0_11 = arith.constant 0 : index
    %c0_12 = arith.constant 0 : index
    %c0_13 = arith.constant 0 : index
    %c0_14 = arith.constant 0 : index
    %56 = vector.load %arg7[%c0_11, %c0_12, %c0_13, %c0_14] : memref<1x4x8x8xf32, #tpu.memory_space<vmem>>, vector<1x4x8x8xf32>
    %57 = vector.shape_cast %56 : vector<1x4x8x8xf32> to vector<4x8x8xf32>
    %58 = vector.shape_cast %55 : vector<4x8x8xf32> to vector<1x4x8x8xf32>
    tpu.vector_store %arg7[%c0_11, %c0_12, %c0_13, %c0_14], %58 {strides = array<i32>} : memref<1x4x8x8xf32, #tpu.memory_space<vmem>>, vector<1x4x8x8xf32>,
    "tpu.trace_start"() <{level = 10 : i32, message = "hqk,hkd->hqd"}> : () -> ()
    %cst_15 = arith.constant dense<0.000000e+00> : vector<4x8x8xf32>
    %59 = tpu.matmul %55, %36, %cst_15 {dimension_numbers = #tpu.dot_dimension_numbers<[2], [1], [1], [2], [0, 0, 0, 1, 1, 2], [0], [0]>} : vector<4x8x8xf32>, vector<4x8x8xf32>, vector<4x8x8xf32> -> vector<4x8x8xf32>
    "tpu.trace_stop"() : () -> ()
    %60 = vector.extract_strided_slice %59 {offsets = [0, 0, 0], sizes = [1, 8, 8], strides = [1, 1, 1]} : vector<4x8x8xf32> to vector<1x8x8xf32>
    %61 = vector.shape_cast %60 : vector<1x8x8xf32> to vector<8x8xf32>
    %62 = vector.extract_strided_slice %59 {offsets = [1, 0, 0], sizes = [1, 8, 8], strides = [1, 1, 1]} : vector<4x8x8xf32> to vector<1x8x8xf32>
    %63 = vector.shape_cast %62 : vector<1x8x8xf32> to vector<8x8xf32>
    %64 = vector.extract_strided_slice %59 {offsets = [2, 0, 0], sizes = [1, 8, 8], strides = [1, 1, 1]} : vector<4x8x8xf32> to vector<1x8x8xf32>
    %65 = vector.shape_cast %64 : vector<1x8x8xf32> to vector<8x8xf32>
    %66 = vector.extract_strided_slice %59 {offsets = [3, 0, 0], sizes = [1, 8, 8], strides = [1, 1, 1]} : vector<4x8x8xf32> to vector<1x8x8xf32>
    %67 = vector.shape_cast %66 : vector<1x8x8xf32> to vector<8x8xf32>
    %68 = tpu.concatenate %61, %63, %65, %67 in 1 : vector<8x8xf32>, vector<8x8xf32>, vector<8x8xf32>, vector<8x8xf32> -> vector<8x32xf32>
    %c0_16 = arith.constant 0 : index
    %c0_17 = arith.constant 0 : index
    %69 = vector.load %arg4[%c0_16, %c0_17] : memref<32x32xf32, #tpu.memory_space<vmem>>, vector<32x32xf32>
    %cst_18 = arith.constant dense<0.000000e+00> : vector<8x32xf32>
    %70 = tpu.matmul %68, %69, %cst_18 {dimension_numbers = #tpu.dot_dimension_numbers<[1], [0], [0], [1], [0, 0, 1, 1], [], []>} : vector<8x32xf32>, vector<32x32xf32>, vector<8x32xf32> -> vector<8x32xf32>
    %c0_19 = arith.constant 0 : index
    %c0_20 = arith.constant 0 : index
    %71 = vector.load %arg5[%c0_19, %c0_20] : memref<1x32xf32, #tpu.memory_space<vmem>>, vector<1x32xf32>
    %72 = vector.broadcast %71 : vector<1x32xf32> to vector<8x32xf32>
    %73 = arith.addf %70, %72 : vector<8x32xf32>
    %c0_21 = arith.constant 0 : index
    %c0_22 = arith.constant 0 : index
    %c0_23 = arith.constant 0 : index
    %74 = vector.load %arg6[%c0_21, %c0_22, %c0_23] : memref<1x8x32xf32, #tpu.memory_space<vmem>>, vector<1x8x32xf32>
    %75 = vector.shape_cast %74 : vector<1x8x32xf32> to vector<8x32xf32>
    %76 = vector.shape_cast %73 : vector<8x32xf32> to vector<1x8x32xf32>
    tpu.vector_store %arg6[%c0_21, %c0_22, %c0_23], %76 {strides = array<i32>} : memref<1x8x32xf32, #tpu.memory_space<vmem>>, vector<1x8x32xf32>,
    return
  }
  func.func @transform_0(%arg0: i32) -> (i32, i32, i32) {
    %c0_i32 = arith.constant 0 : i32
    %c0_i32_0 = arith.constant 0 : i32
    %c0_i32_1 = arith.constant 0 : i32
    return %arg0, %c0_i32, %c0_i32_0 : i32, i32, i32
  }
  func.func @transform_1(%arg0: i32) -> (i32, i32) {
    %c0_i32 = arith.constant 0 : i32
    %c0_i32_0 = arith.constant 0 : i32
    %c0_i32_1 = arith.constant 0 : i32
    return %c0_i32, %c0_i32_0 : i32, i32
  }
  func.func @transform_2(%arg0: i32) -> (i32, i32) {
    %c0_i32 = arith.constant 0 : i32
    %c0_i32_0 = arith.constant 0 : i32
    %c0_i32_1 = arith.constant 0 : i32
    return %c0_i32, %c0_i32_0 : i32, i32
  }
  func.func @transform_3(%arg0: i32) -> (i32, i32) {
    %c0_i32 = arith.constant 0 : i32
    %c0_i32_0 = arith.constant 0 : i32
    %c0_i32_1 = arith.constant 0 : i32
    return %c0_i32, %c0_i32_0 : i32, i32
  }
  func.func @transform_4(%arg0: i32) -> (i32, i32) {
    %c0_i32 = arith.constant 0 : i32
    %c0_i32_0 = arith.constant 0 : i32
    %c0_i32_1 = arith.constant 0 : i32
    return %c0_i32, %c0_i32_0 : i32, i32
  }
  func.func @transform_5(%arg0: i32) -> (i32, i32, i32) {
    %c0_i32 = arith.constant 0 : i32
    %c0_i32_0 = arith.constant 0 : i32
    %c0_i32_1 = arith.constant 0 : i32
    return %arg0, %c0_i32, %c0_i32_0 : i32, i32, i32
  }
  func.func @transform_6(%arg0: i32) -> (i32, i32, i32, i32) {
    %c0_i32 = arith.constant 0 : i32
    %c0_i32_0 = arith.constant 0 : i32
    %c0_i32_1 = arith.constant 0 : i32
    %c0_i32_2 = arith.constant 0 : i32
    return %arg0, %c0_i32, %c0_i32_0, %c0_i32_1 : i32, i32, i32, i32
  }
}

</mosaic_0001>

<bundles_post_ra>
// kernel: tpu_custom_call.1
= control target key start
LH: loop header
LB: loop body
LE: loop exit
PB: predicated region body
PF: predicated region fallthrough
CT: control target
= control target key end

     0   :  { %s2115_s0 = inlined_call_operand.hbm [shape: f32[2,8,32], index: 0, kind: input, shape index: {}]   ;;  %s2116_s1 = inlined_call_operand.hbm [shape: f32[32,96], index: 1, kind: input, shape index: {}]   ;;  %s2117_s2 = inlined_call_operand.vmem [shape: f32[1,96], index: 2, kind: input, shape index: {}]   ;;  %s2118_s3 = inlined_call_operand.hbm [shape: f32[32,32], index: 3, kind: input, shape index: {}]   ;;  %s2119_s4 = inlined_call_operand.vmem [shape: f32[1,32], index: 4, kind: input, shape index: {}]   ;;  %s2120_s5 = inlined_call_operand.hbm [shape: f32[2,8,32], index: 5, kind: output, shape index: {0}]   ;;  %s2121_s6 = inlined_call_operand.hbm [shape: f32[2,4,8,8], index: 6, kind: output, shape index: {1}]  }
   0x1   :  { %2126 = sst [smem:[#allocation15_spill]] %s2116_s1 }
   0x2   :  { %12 = vsyncpa [#allocation3], 0 }
   0x3   :  { %14 = vsyncpa [#allocation3 + $0x1], 0 }
   0x4   :  { %15 = vsyncpa [#allocation6], 0 }
   0x5   :  { %16 = vsyncpa [#allocation4], 0 }
   0x6   :  { %18 = vsyncpa [#allocation4 + $0x1], 0 }
   0x7   :  { %19 = vsyncpa [#allocation10], 0 }
   0x8   :  { %21 = vsyncpa [#allocation10 + $0x1], 0  ;;  %s1798_s21 = smov 0   ;;  %s1800_s22 = smov 0  }
   0x9   :  { %s1802_s23 = smov 0   ;;  %s1804_s24 = smov 0  }
   0xa LB: > { %s1819_s25 = sadd.s32 4294967295, %s1743_s24   ;;  %s1339_s26 = sadd.s32 4294967294, %s1743_s24   ;;  %s1743_s24 = sphi %s1804_s24, %s2145_s24   ;;  %s1739_s23 = sphi %s1802_s23, %s2144_s23   ;;  %s1735_s22 = sphi %s1800_s22, %s2143_s22   ;;  %s1731_s21 = sphi %s1798_s21, %s2142_s21  }
   0xb   : > { %p47_p0 = scmp.ne.s32.totalorder %s1735_s22, %s1731_s21  ;;  %p2122_p1 = scmp.eq.s32.totalorder %s1819_s25, 0 }
   0xc   : > { %p161_p3 = scmp.eq.s32.totalorder %s1339_s26, 1  ;;  %p1340_p5 = scmp.ge.s32.totalorder %s1743_s24, 1 }
   0xd   : > { %p1828_p4 = por %p2122_p1, %p47_p0  ;;  %p194_p7 = scmp.lt.s32.totalorder %s1743_s24, 3 }
   0xe   : > { %p1833_p6 = por %p161_p3, %p47_p0  ;;  %s1745_s30 = smov [#allocation5]  }
   0xf   : > { %s2127_s27 = scalar_select %p1828_p4, 1, 0 }
  0x10   : > { %s2128_s28 = scalar_select %p1833_p6, 1, 0 }
  0x11   : > { %p1838_p8 = pnand %p1340_p5, %p194_p7  ;;  %s206_s7 = sshll.u32 %s1745_s30, 4  ;;  %s207_s7 = int_to_ptr.vmem [resolvable:$true] %s206_s7 }
  0x12   : > { %s1746_s9 = smov [#allocation7]   ;;  %s1576_s11 = scalar_lea.vmem %s207_s7, 512 }
  0x13   : > { %s2129_s29 = scalar_select %p1838_p8, 1, 0 }
  0x14   : > { %p1478_p9 = pneg %p1838_p8  ;;  %s222_s10 = sshll.u32 %s1746_s9, 4  ;;  %s223_s10 = int_to_ptr.vmem [resolvable:$true] %s222_s10 }
  0x15   : > { %p1577_p13 = scmp.ne.s32.totalorder %s207_s7, %s1576_s11  ;;  %p1584_p5 = scmp.lt.s32.totalorder %s207_s7, %s207_s7 }
  0x16   : > { %p1847_p11 = pnand %p1478_p9, %p2122_p1  ;;  %p1585_p7 = scmp.lt.s32.totalorder %s1576_s11, %s1576_s11 }
  0x18   : > { %p1567_p12 = pneg %p1847_p11  ;;  %p1586_p10 = por %p1585_p7, %p1584_p5 }
  0x1a   : > { %p1579_p0 = pnand %p1577_p13, %p1567_p12 }
  0x1c   : > { %p1580_p3 = pneg %p1579_p0 }
  0x1e   : > { %p1587_p9 = pnand %p1586_p10, %p1580_p3 }
  0x20   : > { %1590 = shalt.err (!%p1587_p9)
}
  0x21   : > { %s1747_s12 = smov 128   ;;  %s1748_s13 = smov 8  }
  0x22   : > { %s2131_s1 = sld [smem:[#allocation15_spill]]  ;;  %s1602_s16 = scalar_lea.vmem %s223_s10, 512 }
  0x23   : > { %p1603_p1 = scmp.ne.s32.totalorder %s223_s10, %s1602_s16  ;;  %p1610_p2 = scmp.lt.s32.totalorder %s223_s10, %s223_s10 }
  0x24   : > { %p1611_p6 = scmp.lt.s32.totalorder %s1602_s16, %s1602_s16 }
  0x25   : > { %p1605_p13 = pnand %p1603_p1, %p1567_p12 }
  0x26   : > { %p1612_p5 = por %p1611_p6, %p1610_p2 }
  0x27   : > { %p1606_p0 = pneg %p1605_p13 }
  0x28   : > { %1481 = dma.hbm_to_vmem [thread:$0]  (!%p1847_p11), %s2131_s1, 512, %s207_s7, [#allocation6], %s1747_s12, %s1747_s12, %s1748_s13  }
  0x29   : > { %p1613_p10 = pnand %p1612_p5, %p1606_p0 }
  0x2b   : > { %1616 = shalt.err (!%p1613_p10)
}
  0x2c   : > { %1484 = dma.hbm_to_vmem [thread:$0]  (!%p1847_p11), %s2118_s3, 512, %s223_s10, [#allocation6], %s1747_s12, %s1747_s12, %s1748_s13  }
  0x2d   : > { %s1870_s19 = sadd.s32 1, %s1743_s24   ;;  %s34_s20 = sadd.s32 1, %s1739_s23 }
  0x2e   : > { %s31_s26 = ssub.s32 %s1743_s24, %s1870_s19  ;;  %p41_p1 = scmp.ne.s32.totalorder %s1739_s23, %s1735_s22 }
  0x2f   : > { %p32_p2 = scmp.eq.s32.totalorder %s31_s26, 0  ;;  %p42_p6 = scmp.eq.s32.totalorder %s1743_s24, 0 }
  0x30   : > { %p2132_p12 = scmp.eq.s32.totalorder %s1819_s25, 1  ;;  %p1498_p7 = scmp.lt.s32.totalorder %s1743_s24, 2 }
  0x31   : > { %s1886_s7 = scalar_select %p32_p2, %s1739_s23, %s34_s20  }
  0x32   : > { %p1880_p3 = por %p2132_p12, %p41_p1  ;;  %p43_p9 = por %p42_p6, %p41_p1 }
  0x33   : > { %s239_s8 = sand.u32 1, %s1739_s23   ;;  %s1345_s10 = sshll.u32 %s1743_s24, 7 }
  0x34   : > { %s2133_s30 = scalar_select %p1880_p3, 1, 0 }
  0x35   : > { %s1344_s9 = sshll.u32 %s239_s8, 3  ;;  %s1893_s13 = scalar_lea.hbm %s2115_s0, %s1345_s10 }
  0x36   : > { %s243_s14 = scalar_lea.vmem [#allocation2], %s1344_s9  ;;  %p1895_p11 = pnand %p1498_p7, %p43_p9 }
  0x37   : > { %s250_s15 = sshll.u32 %s243_s14, 4  ;;  %s240_s17 = scalar_lea.sflag [#allocation3], %s239_s8  ;;  %s251_s15 = int_to_ptr.vmem [resolvable:$true] %s250_s15 }
  0x38   : > { %s1617_s18 = scalar_lea.hbm %s1893_s13, 128  ;;  %p1619_p0 = pneg %p1895_p11 }
  0x39   : > { %p1618_p13 = scmp.ne.s32.totalorder %s1893_s13, %s1617_s18  ;;  %s1622_s10 = scalar_lea.hbm %s2115_s0, 256 }
  0x3a   : > { %p1623_p1 = scmp.lt.s32.totalorder %s1893_s13, %s2115_s0  ;;  %p1624_p2 = scmp.lt.s32.totalorder %s1622_s10, %s1617_s18 }
  0x3b   : > { %p1620_p5 = pnand %p1619_p0, %p1618_p13 }
  0x3c   : > { %p1625_p6 = por %p1624_p2, %p1623_p1 }
  0x3d   : > { %p1621_p10 = pneg %p1620_p5 }
  0x3f   : > { %p1626_p12 = pnand %p1625_p6, %p1621_p10 }
  0x41   : > { %1629 = shalt.err (!%p1626_p12)
}
  0x42   : > { %s1630_s12 = scalar_lea.vmem %s251_s15, 128  ;;  %s1749_s8 = smov [#allocation2]  }
  0x43   : > { %p1631_p7 = scmp.ne.s32.totalorder %s251_s15, %s1630_s12  ;;  %s1635_s14 = sshll.u32 %s1749_s8, 4  ;;  %s1636_s14 = int_to_ptr.vmem [resolvable:$false] %s1635_s14 }
  0x44   : > { %s1637_s1 = scalar_lea.vmem %s1636_s14, 256  ;;  %p1638_p13 = scmp.lt.s32.totalorder %s251_s15, %s1636_s14 }
  0x45   : > { %p1633_p9 = pnand %p1631_p7, %p1619_p0  ;;  %p1639_p5 = scmp.lt.s32.totalorder %s1637_s1, %s1630_s12 }
  0x47   : > { %p1634_p3 = pneg %p1633_p9  ;;  %p1640_p4 = por %p1639_p5, %p1638_p13 }
  0x49   : > { %p1641_p8 = pnand %p1640_p4, %p1634_p3 }
  0x4b   : > { %1644 = shalt.err (!%p1641_p8)
}
  0x4c   : > { %1488 = dma.hbm_to_vmem [thread:$0]  (!%p1895_p11), %s1893_s13, 128, %s251_s15, %s240_s17  }
  0x4d   : > { %p2135_p10 = scmp.ne.s32.totalorder %s2129_s29, 0 }
  0x4e   : > { %s1916_s18 = sand.u32 (!%p2135_p10), 1, %s1735_s22   ;;  %p2136_p4 = scmp.ne.s32.totalorder (!%p2135_p10), %s2127_s27, 0 }
  0x4f   : > { %259 = sbr.rel (%p2135_p10) target bundleno = 1569 (0x621), region = 40  ;;  %s1347_s20 = sshll.u32 (!%p2135_p10), %s1916_s18, 3 }
  0x50   : > { %s262_s26 = scalar_lea.sflag (!%p2135_p10), [#allocation3], %s1916_s18  ;;  %s265_s1 = scalar_lea.vmem (!%p2135_p10), [#allocation2], %s1347_s20 }
  0x54   : > { %1714 = dma.done.wait (%p2136_p4), %s262_s26, 128  }
  0x55   : > { %1716 = vsyncadd (%p2136_p4), %s262_s26, 4294967168  ;;  %p2137_p8 = scmp.eq.s32.totalorder %s1819_s25, 0 }
  0x57   : > { %1718 = dma.done.wait (%p2137_p8), [#allocation6], 1024   ;;  %p2138_p3 = pmov %p2137_p8 }
  0x58   : > { %v1750_v0 = vmov 0.0   ;;  %vm1751_vm0 = vmmov 0   ;;  %v311_v1 = vld [vmem:[#allocation5 + $0x18] sm:$0xff]  ;;  %v310_v2 = vld [vmem:[#allocation5 + $0x10] sm:$0xff]  ;;  %v309_v3 = vld [vmem:[#allocation5 + $0x8] sm:$0xff]  ;;  %vm319_vm1 = vcmask 261120  }
  0x59   : > { %1720 = vsyncadd (%p2138_p3), [#allocation6], 4294966272  ;;  %1402 = vmatprep.subr.mxu0 %v1750_v0  ;;  %1410 = vmatprep.mubr.msk.f32.mxu0 %vm1751_vm0, %v1750_v0  ;;  %v308_v4 = vld [vmem:[#allocation5] sm:$0xff]  ;;  %v307_v5 = vld [vmem:[%s265_s1] sm:$0xff]  ;;  %s1752_s13 = smov 104   ;;  %s1753_s15 = smov 120  }
  0x5a   : > { %1413 = vmatprep.subr.mxu1 %v1750_v0  ;;  %1415 = vmatprep.mubr.msk.f32.mxu1 %vm1751_vm0, %v1750_v0  ;;  %v1352_v6 = vld [vmem:[%s2117_s2] ss:$0 sm:$0xff]  ;;  %s1754_s16 = smov 96   ;;  %s1755_s17 = smov 112   ;;  %vm402_vm2 = vcmask 64512   ;;  %vm1094_vm3 = vcmask 130048  }
  0x5b   : > { %1403 = vmatpush3.msra.mxu0 %v311_v1  ;;  %s1756_s10 = smov 64   ;;  %s1351_s11 = sshll.u32 %s1916_s18, 5  ;;  %vm1096_vm4 = vcmask 195584  }
  0x5c   : > { %1404 = vmatprep.subr.mxu0 %v1750_v0  ;;  %s2004_s9 = scalar_lea.vmem [#allocation9], %s1351_s11  ;;  %s1757_s12 = smov 8  }
  0x5d   : > { %1405 = vmatpush3.msra.mxu0 %v310_v2  ;;  %s1758_s8 = smov 16   ;;  %s1759_s14 = smov 24  }
  0x5e   : > { %1406 = vmatprep.subr.mxu0 %v1750_v0  ;;  %s1375_s26 = sshll.u32 %s1819_s25, 9  ;;  %s1215_s1 = sshll.u32 %s2004_s9, 4  ;;  %s2042_s1 = int_to_ptr.vmem [resolvable:$true] %s1215_s1 }
  0x5f   : > { %1407 = vmatpush3.msra.mxu0 %v309_v3  ;;  %p2139_p0 = scmp.ne.s32.totalorder %s2133_s30, 0 }
  0x60   : > { %1408 = vmatprep.subr.mxu0 %v1750_v0 }
  0x61   : > { %1409 = vmatpush3.msra.mxu0 %v308_v4 }
  0x62   : > { %1411 = vmatmul.mubr.msk.f32.vlgmr.msra.gmra.mxu0 %vm319_vm1, %v307_v5  ;;  %1433 = vmatprep.subr.mxu0 %v1750_v0 }
  0x63   : > { %1435 = vmatprep.mubr.msk.f32.mxu0 %vm1751_vm0, %v1750_v0 }
 0x122   : > { %v389_v7 = vpop.f32.mrf.mxu0 }
 0x123   : > { %v1946_v8 = vadd.f32 %v1352_v6, %v389_v7 }
 0x124   : > { %v1412_v9 = vpop.f32.mrf.mxu0 }
 0x125   : > { %398 = vrot.lane.b32.xlu1 %v1946_v8, %s1752_s13  ;;  %394 = vrot.lane.b32.xlu0 %v1946_v8, %s1753_s15  ;;  %s2040_s13 = scalar_lea.hbm %s2121_s6, %s1375_s26  ;;  %s1189_s15 = scalar_lea.sflag [#allocation10], %s1916_s18 }
 0x129   : > { %400 = vrot.lane.b32.xlu1 %v1946_v8, %s1754_s16  ;;  %396 = vrot.lane.b32.xlu0 %v1946_v8, %s1755_s17  ;;  %s1760_s17 = smov [#allocation9]  }
 0x197   : > { %v1952_v10 = vpop.permute.xlu1 %398  ;;  %v1954_v11 = vpop.permute.xlu0 %394 }
 0x198   : > { %477 = vrot.lane.b32.xlu0 %v1954_v11, %s1754_s16 }
 0x19b   : > { %v401_v12 = vpop.permute.xlu1 %400  ;;  %v1957_v13 = vpop.permute.xlu0 %396 }
 0x19c   : > { %1414 = vmatpush3.xpose.msk.msra.mxu1 %vm402_vm2, %v401_v12  ;;  %629 = vrot.lane.b32.xlu0 %v1952_v10, %s1754_s16 }
 0x19d   : > { %553 = vrot.lane.b32.xlu1 %v1957_v13, %s1754_s16  ;;  %1418 = vmatprep.subr.mxu1 %v1750_v0  ;;  %s1645_s16 = scalar_lea.vmem %s2042_s1, 512 }
 0x19e   : > { %p1646_p11 = scmp.ne.s32.totalorder %s2042_s1, %s1645_s16 }
 0x19f   : > { %1416 = vmatmul.mubr.msk.f32.vlgmr.msra.gmra.mxu1 %vm402_vm2, %v1946_v8 }
 0x1a0   : > { %1420 = vmatprep.mubr.msk.f32.mxu1 %vm1751_vm0, %v1750_v0  ;;  %p1647_p1 = pnand %p1646_p11, %p2139_p0 }
 0x1a2   : > { %p1648_p2 = pneg %p1647_p1 }
 0x20a   : > { %v478_v14 = vpop.permute.xlu0 %477 }
 0x20b   : > { %1419 = vmatpush3.xpose.msk.msra.mxu1 %vm402_vm2, %v478_v14 }
 0x20c   : > { %1423 = vmatprep.subr.mxu1 %v1750_v0 }
 0x20e   : > { %1421 = vmatmul.mubr.msk.f32.vlgmr.msra.gmra.mxu1 %vm402_vm2, %v1954_v11  ;;  %v630_v16 = vpop.permute.xlu0 %629 }
 0x20f   : > { %v554_v15 = vpop.permute.xlu1 %553  ;;  %1425 = vmatprep.mubr.msk.f32.mxu1 %vm1751_vm0, %v1750_v0 }
 0x210   : > { %1424 = vmatpush3.xpose.msk.msra.mxu1 %vm402_vm2, %v554_v15 }
 0x211   : > { %1428 = vmatprep.subr.mxu1 %v1750_v0 }
 0x213   : > { %1426 = vmatmul.mubr.msk.f32.vlgmr.msra.gmra.mxu1 %vm402_vm2, %v1957_v13 }
 0x214   : > { %1429 = vmatpush3.xpose.msk.msra.mxu1 %vm402_vm2, %v630_v16  ;;  %1430 = vmatprep.mubr.msk.f32.mxu1 %vm1751_vm0, %v1750_v0 }
 0x215   : > { %1438 = vmatprep.subr.mxu1 %v1750_v0 }
 0x217   : > { %1431 = vmatmul.mubr.msk.f32.vlgmr.msra.gmra.mxu1 %vm402_vm2, %v1952_v10 }
 0x218   : > { %1440 = vmatprep.mubr.msk.f32.mxu1 %vm1751_vm0, %v1750_v0 }
 0x25f   : > { %v473_v17 = vpop.f32.mrf.mxu1 }
 0x260   : > { %v705_v18 = vsel %vm402_vm2, %v473_v17, -inf }
 0x261   : > { %v1417_v19 = vpop.f32.mrf.mxu1  ;;  %706 = vmax.xlane.f32.xlu1 %v705_v18 }
 0x2ce   : > { %v549_v20 = vpop.f32.mrf.mxu1 }
 0x2cf   : > { %v708_v21 = vsel %vm402_vm2, %v549_v20, -inf }
 0x2d0   : > { %709 = vmax.xlane.f32.xlu0 %v708_v21  ;;  %v1422_v22 = vpop.f32.mrf.mxu1 }
 0x2d3   : > { %v625_v23 = vpop.f32.mrf.mxu1 }
 0x2d4   : > { %v711_v24 = vsel %vm402_vm2, %v625_v23, -inf }
 0x2d5   : > { %712 = vmax.xlane.f32.xlu0 %v711_v24  ;;  %v1427_v25 = vpop.f32.mrf.mxu1 }
 0x2d7   : > { %v701_v26 = vpop.f32.mrf.mxu1 }
 0x2d8   : > { %v714_v27 = vsel %vm402_vm2, %v701_v26, -inf }
 0x2d9   : > { %715 = vmax.xlane.f32.xlu1 %v714_v27  ;;  %v1432_v28 = vpop.f32.mrf.mxu1 }
 0x2da   : > { %v1101_v28 = vld [vmem:[#allocation7 + $0x18] sm:$0xff] }
 0x2ea   : > { %v707_v29 = vpop.xlane.xlu1 %706 }
 0x2eb   : > { %v717_v30 = vsub.f32 %v473_v17, %v707_v29  ;;  %v1100_v29 = vld [vmem:[#allocation7 + $0x10] sm:$0xff] }
 0x2ed   : > { %v721_v31 = vmul.f32 1.442695, %v717_v30  ;;  %v1099_v30 = vld [vmem:[#allocation7 + $0x8] sm:$0xff] }
 0x2ef   : > { %1549 = vpow2.f32 %v721_v31  ;;  %v1098_v31 = vld [vmem:[#allocation7] sm:$0xff] }
 0x2fc   : > { %v1550_v32 = vpop.eup %1549 }
 0x2fd   : > { %v729_v33 = vsel %vm402_vm2, %v1550_v32, 0.0 }
 0x2fe   : > { %730 = vadd.xlane.f32.xlu0 %v729_v33 }
 0x359   : > { %v710_v34 = vpop.xlane.xlu0 %709 }
 0x35a   : > { %v718_v35 = vsub.f32 %v549_v20, %v710_v34 }
 0x35c   : > { %v723_v36 = vmul.f32 1.442695, %v718_v35 }
 0x35e   : > { %1551 = vpow2.f32 %v723_v36  ;;  %v713_v37 = vpop.xlane.xlu0 %712 }
 0x35f   : > { %v719_v38 = vsub.f32 %v625_v23, %v713_v37 }
 0x361   : > { %v725_v39 = vmul.f32 1.442695, %v719_v38 }
 0x362   : > { %v716_v40 = vpop.xlane.xlu1 %715 }
 0x363   : > { %1553 = vpow2.f32 %v725_v39  ;;  %v720_v41 = vsub.f32 %v701_v26, %v716_v40 }
 0x365   : > { %v727_v42 = vmul.f32 1.442695, %v720_v41 }
 0x367   : > { %1555 = vpow2.f32 %v727_v42 }
 0x36b   : > { %v1552_v43 = vpop.eup %1551 }
 0x36c   : > { %v732_v44 = vsel %vm402_vm2, %v1552_v43, 0.0 }
 0x36d   : > { %733 = vadd.xlane.f32.xlu1 %v732_v44 }
 0x370   : > { %v1991_v45 = vpop.eup %1553 }
 0x371   : > { %v735_v46 = vsel %vm402_vm2, %v1991_v45, 0.0 }
 0x372   : > { %736 = vadd.xlane.f32.xlu0 %v735_v46 }
 0x374   : > { %v1995_v47 = vpop.eup %1555 }
 0x375   : > { %v738_v48 = vsel %vm402_vm2, %v1995_v47, 0.0 }
 0x376   : > { %739 = vadd.xlane.f32.xlu1 %v738_v48 }
 0x387   : > { %853 = vrot.lane.b32.xlu1 %v1954_v11, %s1756_s10  ;;  %v731_v49 = vpop.xlane.xlu0 %730 }
 0x388   : > { %777 = vrot.lane.b32.xlu0 %v1946_v8, %s1756_s10  ;;  %1557 = vrcp.f32 %v731_v49 }
 0x38b   : > { %929 = vrot.lane.b32.xlu1 %v1957_v13, %s1756_s10 }
 0x38c   : > { %1005 = vrot.lane.b32.xlu0 %v1952_v10, %s1756_s10  ;;  %s1649_s10 = sshll.u32 %s1760_s17, 4  ;;  %s1650_s10 = int_to_ptr.vmem [resolvable:$false] %s1649_s10 }
 0x38d   : > { %s1651_s11 = scalar_lea.vmem %s1650_s10, 1024  ;;  %p1652_p6 = scmp.lt.s32.totalorder %s2042_s1, %s1650_s10 }
 0x38e   : > { %p1653_p12 = scmp.lt.s32.totalorder %s1651_s11, %s1645_s16 }
 0x390   : > { %p1654_p7 = por %p1653_p12, %p1652_p6 }
 0x392   : > { %p1655_p9 = pnand %p1654_p7, %p1648_p2 }
 0x395   : > { %v1558_v50 = vpop.eup %1557 }
 0x396   : > { %v745_v51 = vmul.f32 %v1558_v50, %v731_v49 }
 0x398   : > { %v749_v52 = vsub.f32 2.0, %v745_v51 }
 0x39a   : > { %v753_v53 = vmul.f32 %v1558_v50, %v749_v52 }
 0x39c   : > { %v757_v54 = vmul.f32 %v753_v53, %v731_v49 }
 0x39e   : > { %v761_v55 = vsub.f32 2.0, %v757_v54 }
 0x3a0   : > { %v765_v56 = vmul.f32 %v761_v55, %v753_v53 }
 0x3a2   : > { %v769_v57 = vmul.f32 %v1550_v32, %v765_v56 }
 0x3a4   : > { %773 = vst.msk [vmem:[%s2004_s9] sm:$0xff] %vm402_vm2, %v769_v57 }
 0x3f6   : > { %v734_v58 = vpop.xlane.xlu1 %733 }
 0x3f7   : > { %1559 = vrcp.f32 %v734_v58 }
 0x3fb   : > { %v737_v59 = vpop.xlane.xlu0 %736 }
 0x3fc   : > { %1561 = vrcp.f32 %v737_v59 }
 0x3ff   : > { %v740_v60 = vpop.xlane.xlu1 %739  ;;  %v778_v61 = vpop.permute.xlu0 %777 }
 0x400   : > { %1563 = vrcp.f32 %v740_v60  ;;  %1434 = vmatpush3.msra.mxu0 %v778_v61 }
 0x401   : > { %1436 = vmatmul.mubr.msk.f32.vlgmr.msra.gmra.mxu0 %vm402_vm2, %v769_v57  ;;  %1443 = vmatprep.subr.mxu0 %v1750_v0 }
 0x402   : > { %1445 = vmatprep.mubr.msk.f32.mxu0 %vm1751_vm0, %v1750_v0 }
 0x403   : > { %v854_v62 = vpop.permute.xlu1 %853  ;;  %v1006_v19 = vpop.permute.xlu0 %1005 }
 0x404   : > { %v1560_v63 = vpop.eup %1559  ;;  %1439 = vmatpush3.msra.mxu1 %v854_v62 }
 0x405   : > { %v746_v1 = vmul.f32 %v1560_v63, %v734_v58  ;;  %1448 = vmatprep.subr.mxu1 %v1750_v0 }
 0x407   : > { %v750_v2 = vsub.f32 2.0, %v746_v1  ;;  %v930_v3 = vpop.permute.xlu1 %929 }
 0x408   : > { %1444 = vmatpush3.msra.mxu0 %v930_v3 }
 0x409   : > { %v1562_v4 = vpop.eup %1561  ;;  %v754_v5 = vmul.f32 %v1560_v63, %v750_v2  ;;  %1453 = vmatprep.subr.mxu0 %v1750_v0 }
 0x40a   : > { %v747_v6 = vmul.f32 %v1562_v4, %v737_v59 }
 0x40b   : > { %v758_v7 = vmul.f32 %v754_v5, %v734_v58 }
 0x40c   : > { %v751_v8 = vsub.f32 2.0, %v747_v6 }
 0x40d   : > { %v1564_v9 = vpop.eup %1563  ;;  %v762_v10 = vsub.f32 2.0, %v758_v7 }
 0x40e   : > { %v755_v11 = vmul.f32 %v1562_v4, %v751_v8  ;;  %v748_v12 = vmul.f32 %v1564_v9, %v740_v60 }
 0x40f   : > { %v766_v13 = vmul.f32 %v762_v10, %v754_v5 }
 0x410   : > { %v759_v14 = vmul.f32 %v755_v11, %v737_v59  ;;  %v752_v15 = vsub.f32 2.0, %v748_v12 }
 0x411   : > { %v770_v16 = vmul.f32 %v1552_v43, %v766_v13 }
 0x412   : > { %v763_v17 = vsub.f32 2.0, %v759_v14  ;;  %v756_v18 = vmul.f32 %v1564_v9, %v752_v15 }
 0x413   : > { %774 = vst.msk [vmem:[%s2004_s9 + $0x8] sm:$0xff] %vm402_vm2, %v770_v16  ;;  %1441 = vmatmul.mubr.msk.f32.vlgmr.msra.gmra.mxu1 %vm402_vm2, %v770_v16 }
 0x414   : > { %v767_v20 = vmul.f32 %v763_v17, %v755_v11  ;;  %v760_v21 = vmul.f32 %v756_v18, %v740_v60  ;;  %1449 = vmatpush3.msra.mxu1 %v1006_v19  ;;  %1450 = vmatprep.mubr.msk.f32.mxu1 %vm1751_vm0, %v1750_v0 }
 0x416   : > { %v771_v22 = vmul.f32 %v1991_v45, %v767_v20  ;;  %v764_v23 = vsub.f32 2.0, %v760_v21 }
 0x418   : > { %775 = vst.msk [vmem:[%s2004_s9 + $0x10] sm:$0xff] %vm402_vm2, %v771_v22  ;;  %v768_v24 = vmul.f32 %v764_v23, %v756_v18  ;;  %1446 = vmatmul.mubr.msk.f32.vlgmr.msra.gmra.mxu0 %vm402_vm2, %v771_v22 }
 0x419   : > { %1461 = vmatprep.mubr.msk.f32.mxu0 %vm1751_vm0, %v1750_v0  ;;  %1454 = vmatpush3.msra.mxu0 %v1101_v28 }
 0x41a   : > { %v772_v25 = vmul.f32 %v1995_v47, %v768_v24  ;;  %1455 = vmatprep.subr.mxu0 %v1750_v0 }
 0x41b   : > { %1456 = vmatpush3.msra.mxu0 %v1100_v29 }
 0x41c   : > { %776 = vst.msk [vmem:[%s2004_s9 + $0x18] sm:$0xff] %vm402_vm2, %v772_v25  ;;  %1451 = vmatmul.mubr.msk.f32.vlgmr.msra.gmra.mxu1 %vm402_vm2, %v772_v25  ;;  %1457 = vmatprep.subr.mxu0 %v1750_v0 }
 0x41d   : > { %1458 = vmatpush3.msra.mxu0 %v1099_v30 }
 0x41e   : > { %1459 = vmatprep.subr.mxu0 %v1750_v0 }
 0x41f   : > { %1460 = vmatpush3.msra.mxu0 %v1098_v31 }
 0x4c1   : > { %v849_v26 = vpop.f32.mrf.mxu0 }
 0x4c3   : > { %v1437_v27 = vpop.f32.mrf.mxu0 }
 0x4d3   : > { %v925_v32 = vpop.f32.mrf.mxu1 }
 0x4d4   : > { %1082 = vrot.lane.b32.xlu1 %v925_v32, %s1757_s12 }
 0x4d5   : > { %v1442_v33 = vpop.f32.mrf.mxu1 }
 0x4d8   : > { %v1001_v34 = vpop.f32.mrf.mxu0 }
 0x4d9   : > { %1086 = vrot.lane.b32.xlu0 %v1001_v34, %s1758_s8 }
 0x4da   : > { %v1447_v35 = vpop.f32.mrf.mxu0 }
 0x4dc   : > { %v1077_v36 = vpop.f32.mrf.mxu1 }
 0x4dd   : > { %1090 = vrot.lane.b32.xlu1 %v1077_v36, %s1759_s14 }
 0x4de   : > { %v1452_v37 = vpop.f32.mrf.mxu1 }
 0x546   : > { %v1083_v38 = vpop.permute.xlu1 %1082 }
 0x547   : > { %v1093_v39 = vsel %vm402_vm2, %v849_v26, %v1083_v38 }
 0x54b   : > { %v1087_v0 = vpop.permute.xlu0 %1086 }
 0x54c   : > { %v1095_v40 = vsel %vm1094_vm3, %v1093_v39, %v1087_v0 }
 0x54f   : > { %v1091_v41 = vpop.permute.xlu1 %1090 }
 0x550   : > { %v1097_v42 = vsel %vm1096_vm4, %v1095_v40, %v1091_v41 }
 0x551   : > { %1462 = vmatmul.mubr.msk.f32.vlgmr.msra.gmra.mxu0 %vm319_vm1, %v1097_v42 }
 0x552   : > { %1658 = shalt.err (!%p1655_p9)
}
 0x553   : > { %s1659_s9 = scalar_lea.hbm %s2040_s13, 512  ;;  %s1663_s26 = scalar_lea.hbm %s2121_s6, 1024 }
 0x554   : > { %p1660_p13 = scmp.ne.s32.totalorder %s2040_s13, %s1659_s9  ;;  %p1664_p4 = scmp.lt.s32.totalorder %s2040_s13, %s2121_s6 }
 0x555   : > { %p1665_p8 = scmp.lt.s32.totalorder %s1663_s26, %s1659_s9 }
 0x556   : > { %p1661_p5 = pnand %p1660_p13, %p2139_p0 }
 0x557   : > { %p1666_p3 = por %p1665_p8, %p1664_p4 }
 0x558   : > { %p1662_p10 = pneg %p1661_p5 }
 0x55a   : > { %p1667_p11 = pnand %p1666_p3, %p1662_p10 }
 0x55c   : > { %1670 = shalt.err (!%p1667_p11)
}
 0x55d   : > { %s1761_s16 = smov 128   ;;  %v1366_v43 = vld [vmem:[%s2119_s4] ss:$0 sm:$0xff]  ;;  %s1370_s11 = sshll.u32 %s1819_s25, 7 }
 0x55e   : > { %1475 = dma.vmem_to_hbm [thread:$0]  (%p2139_p0), %s2042_s1, 512, %s2040_s13, %s1189_s15, %s1761_s16, %s1761_s16, %s1757_s12  }
 0x55f   : > { %s299_s9 = scalar_lea.vmem [#allocation8], %s1347_s20  ;;  %s2077_s27 = scalar_lea.hbm %s2120_s5, %s1370_s11 }
 0x560   : > { %s1202_s8 = sshll.u32 %s299_s9, 4  ;;  %s1184_s12 = scalar_lea.sflag [#allocation4], %s1916_s18  ;;  %s1203_s8 = int_to_ptr.vmem [resolvable:$true] %s1202_s8 }
 0x561   : > { %s1671_s1 = scalar_lea.vmem %s1203_s8, 128  ;;  %s1762_s25 = smov [#allocation8]  }
 0x562   : > { %p1672_p1 = scmp.ne.s32.totalorder %s1203_s8, %s1671_s1  ;;  %s1675_s20 = sshll.u32 %s1762_s25, 4  ;;  %s1676_s20 = int_to_ptr.vmem [resolvable:$false] %s1675_s20 }
 0x563   : > { %s1677_s13 = scalar_lea.vmem %s1676_s20, 256  ;;  %p1678_p12 = scmp.lt.s32.totalorder %s1203_s8, %s1676_s20 }
 0x564   : > { %p1673_p2 = pnand %p1672_p1, %p2139_p0  ;;  %p1679_p7 = scmp.lt.s32.totalorder %s1677_s13, %s1671_s1 }
 0x566   : > { %p1674_p6 = pneg %p1673_p2  ;;  %p1680_p9 = por %p1679_p7, %p1678_p12 }
 0x568   : > { %p1681_p13 = pnand %p1680_p9, %p1674_p6 }
 0x611   : > { %v1178_v44 = vpop.f32.mrf.mxu0 }
 0x612   : > { %v1179_v45 = vadd.f32 %v1366_v43, %v1178_v44 }
 0x613   : > { %v1463_v46 = vpop.f32.mrf.mxu0 }
 0x614   : > { %1182 = vst.msk [vmem:[%s299_s9] sm:$0xff] %vm319_vm1, %v1179_v45 }
 0x615   : > { %1684 = shalt.err (!%p1681_p13)
}
 0x616   : > { %s1685_s15 = scalar_lea.hbm %s2077_s27, 128  ;;  %s1689_s16 = scalar_lea.hbm %s2120_s5, 256 }
 0x617   : > { %p1686_p5 = scmp.ne.s32.totalorder %s2077_s27, %s1685_s15  ;;  %p1690_p8 = scmp.lt.s32.totalorder %s2077_s27, %s2120_s5 }
 0x618   : > { %p1691_p3 = scmp.lt.s32.totalorder %s1689_s16, %s1685_s15 }
 0x619   : > { %p1687_p10 = pnand %p1686_p5, %p2139_p0 }
 0x61a   : > { %p1692_p11 = por %p1691_p3, %p1690_p8 }
 0x61b   : > { %p1688_p4 = pneg %p1687_p10 }
 0x61d   : > { %p1693_p1 = pnand %p1692_p11, %p1688_p4 }
 0x61f   : > { %1696 = shalt.err (!%p1693_p1)
}
 0x620   : > { %1474 = dma.vmem_to_hbm [thread:$0]  (%p2139_p0), %s1203_s8, 128, %s2077_s27, %s1184_s12  }
 0x621 PF: > { %s1230_s11 = sand.u32 1, %s1731_s21   ;;  %p2140_p2 = scmp.ne.s32.totalorder %s2128_s28, 0 }
 0x622   : > { %p2141_p6 = scmp.ge.s32.totalorder %s1743_s24, 2  ;;  %s1231_s9 = scalar_lea.sflag [#allocation4], %s1230_s11 }
 0x624   : > { %p1490_p12 = pnand %p2141_p6, %p2140_p2 }
 0x626   : > { %p1491_p7 = pneg %p1490_p12 }
 0x628   : > { %1722 = dma.done.wait (%p1491_p7), %s1231_s9, 128  }
 0x629   : > { %1724 = vsyncadd (%p1491_p7), %s1231_s9, 4294967168  ;;  %s1240_s14 = scalar_lea.sflag [#allocation10], %s1230_s11 }
 0x62a   : > { %1726 = dma.done.wait (%p1491_p7), %s1240_s14, 512  }
 0x62b   : > { %1728 = vsyncadd (%p1491_p7), %s1240_s14, 4294966784  ;;  %p24_p0 = scmp.ge.s32.totalorder %s1870_s19, 4   ;;  %s2142_s21 = smov %s1735_s22 }
 0x62c   : > { %s2143_s22 = smov %s1739_s23  ;;  %s2144_s23 = smov %s1886_s7 }
 0x62d   : > { %s2145_s24 = smov %s1870_s19  ;;  %26 = sbr.rel (!%p24_p0) target bundleno = 10 (0xa), region = 110 }
 0x632   :  { %1245 = vsyncpa [#allocation3], 1 }
 0x633   :  { %1247 = vsyncpa [#allocation3 + $0x1], 1 }
 0x634   :  { %1248 = vsyncpa [#allocation6], 1 }
 0x635   :  { %1249 = vsyncpa [#allocation4], 1 }
 0x636   :  { %1251 = vsyncpa [#allocation4 + $0x1], 1 }
 0x637   :  { %1252 = vsyncpa [#allocation10], 1 }
 0x638   :  { %1254 = vsyncpa [#allocation10 + $0x1], 1 }

</bundles_post_ra>
